<compile_context>
chip_gen: v7x
topology: tpu7x:2x2x1
jax: 0.10.0
libtpu: 0.0.40
codegen_flags: <defaults>
</compile_context>

<pallas_src>
import jax
import jax.numpy as jnp
from jax.experimental import pallas as pl
from jax.experimental.pallas import tpu as pltpu

LANE = 128
SUBLANE = 8
MAX_BATCH_TILE = 512            # ~85% of HBM roofline; 1024 only buys ~1% on v5e/v6e
VMEM_BUDGET_BYTES = 18 << 20    # what our own tiling math may consume
VMEM_LIMIT_BYTES = 24 << 20     # explicit scoped limit: > v5e's 16 MiB default,
                                # < v7x's 64 MiB physical VMEM


def _round_up(x, m):
    return ((x + m - 1) // m) * m


def _cdiv(a, b):
    return (a + b - 1) // b


def _nbytes(a):
    return a.size * jnp.dtype(a.dtype).itemsize


# ---------------------------------------------------------------------------
# Fused MLP kernel: one grid step = one batch tile through a group of layers.
# Ref order: (x_ref, w1, b1, w2, b2, ..., wn, bn, o_ref)
# ---------------------------------------------------------------------------
def _make_fused_kernel(n_layers, act_last, precision):
    def kernel(x_ref, *rest):
        o_ref = rest[-1]
        wb = rest[:-1]
        z = x_ref[...].astype(jnp.float32)               # (tm, din)
        for li in range(n_layers):
            w = wb[2 * li][...]                          # (din_p, dout_p)
            b = wb[2 * li + 1][...]                      # (1,    dout_p) f32
            # MXU matmul; operands in the weight dtype (bf16 on v6e/v7x),
            # accumulation always f32.
            z = jnp.dot(z.astype(w.dtype), w,
                        preferred_element_type=jnp.float32,
                        precision=precision) + b
            if li < n_layers - 1 or act_last:
                z = jnp.tanh(z)                          # EUP slot
        o_ref[...] = z.astype(o_ref.dtype)
    return kernel


def _call_fused_group(x, layers, act_last, batch_tile, true_dims, out_dtype,
                      precision):
    """Run consecutive layers (list of (w, b)) fused, gridded over batch."""
    batch_p, din = x.shape
    dout = layers[-1][0].shape[1]
    n = len(layers)

    flat = [x]
    in_specs = [pl.BlockSpec((batch_tile, din), lambda i: (i, 0))]
    for w, b in layers:
        flat += [w, b]
        # Constant index_map -> weights stay VMEM-resident across grid steps.
        in_specs += [pl.BlockSpec(w.shape, lambda i: (0, 0)),
                     pl.BlockSpec(b.shape, lambda i: (0, 0))]

    # Advisory cost from TRUE (unpadded) dims.
    flops = 2 * batch_p * sum(true_dims[i] * true_dims[i + 1] for i in range(n))
    n_act = n if act_last else n - 1
    transcendentals = batch_p * sum(true_dims[1:1 + n_act])
    bytes_accessed = (sum(_nbytes(a) for a in flat)
                      + batch_p * dout * jnp.dtype(out_dtype).itemsize)

    return pl.pallas_call(
        _make_fused_kernel(n, act_last, precision),
        out_shape=jax.ShapeDtypeStruct((batch_p, dout), out_dtype),
        grid=(batch_p // batch_tile,),
        in_specs=in_specs,
        out_specs=pl.BlockSpec((batch_tile, dout), lambda i: (i, 0)),
        compiler_params=pltpu.CompilerParams(
            dimension_semantics=("parallel",),        # megacore split on v7x
            vmem_limit_bytes=VMEM_LIMIT_BYTES,
        ),
        cost_estimate=pl.CostEstimate(
            flops=flops,
            transcendentals=transcendentals,
            bytes_accessed=bytes_accessed,
        ),
    )(*flat)


# ---------------------------------------------------------------------------
# One-time parameter preparation (pad hidden dims to 128 lanes, cast dtype).
# ---------------------------------------------------------------------------
def prepare_fnn_params(params, dtype=jnp.float32):
    """params: list of (w:(din,dout), b:(1,dout) or (dout,)).

    Pads ONLY the hidden feature dims to the 128-lane width (input/output dims
    stay true-sized so HBM I/O is not inflated) and casts weights to `dtype`
    (use jnp.bfloat16 on v6e/v7x).  Call once and cache the result.
    """
    n = len(params)
    dims = [params[0][0].shape[0]] + [w.shape[1] for w, _ in params]
    layers = []
    for li, (w, b) in enumerate(params):
        din, dout = w.shape
        din_p = din if li == 0 else _round_up(din, LANE)
        dout_p = dout if li == n - 1 else _round_up(dout, LANE)
        w_p = jnp.zeros((din_p, dout_p), dtype).at[:din, :dout].set(w.astype(dtype))
        b_p = jnp.zeros((1, dout_p), jnp.float32).at[:, :dout].set(
            jnp.asarray(b, jnp.float32).reshape(1, -1))
        layers.append((w_p, b_p))
    return {"layers": layers, "dims": dims}


def _group_layers(layers, weight_budget_bytes):
    """Greedily split layers into consecutive groups whose double-buffered
    weights fit `weight_budget_bytes`.  Returns a list of (start, end)."""
    groups = []
    start, cur_bytes = 0, 0
    for li, (w, b) in enumerate(layers):
        nbytes = 2 * (_nbytes(w) + _nbytes(b))     # 2x: BlockSpec double-buffers
        if nbytes > weight_budget_bytes:
            # TODO(synk): tile over K/N for a single oversized layer instead of failing.
            raise NotImplementedError(
                "a single layer's weights exceed the VMEM weight budget")
        if li > start and cur_bytes + nbytes > weight_budget_bytes:
            groups.append((start, li))
            start, cur_bytes = li, 0
        cur_bytes += nbytes
    groups.append((start, len(layers)))
    return groups


# ---------------------------------------------------------------------------
# Forward pass.
# ---------------------------------------------------------------------------
def fnn_forward(prepared, momenta, precision=None):
    """prepared: output of prepare_fnn_params; momenta: (B, Din) f32.

    Note: with f32 weights and precision=None the matmul uses the default MXU
    precision (same as the pure-JAX reference); pass
    precision=jax.lax.Precision.HIGHEST for strict f32 parity.
    """
    layers = prepared["layers"]
    dims = prepared["dims"]
    batch, din0 = momenta.shape
    assert din0 == dims[0], (din0, dims[0])
    dout_final = layers[-1][0].shape[1]
    x_itemsize = jnp.dtype(momenta.dtype).itemsize

    # ---- split layers into VMEM-resident groups (usually a single group) ---
    groups = _group_layers(layers, VMEM_BUDGET_BYTES // 2)
    max_group_wbytes = max(
        sum(2 * (_nbytes(w) + _nbytes(b)) for w, b in layers[s:e])
        for s, e in groups)

    # ---- derive the batch tile from the VMEM budget ------------------------
    max_width = max(din0, max(w.shape[1] for w, _ in layers))
    # 2x double-buffered in tile + 2x out tile + ~2 f32 intermediate temporaries
    per_row_bytes = 4 * max_width * x_itemsize + 2 * max_width * 4
    avail = VMEM_BUDGET_BYTES - max_group_wbytes
    tm_by_vmem = max(SUBLANE, (avail // per_row_bytes) // SUBLANE * SUBLANE)

    batch_r = _round_up(batch, SUBLANE)
    max_tile = min(MAX_BATCH_TILE, tm_by_vmem)
    if batch_r >= 2 * SUBLANE:
        # Guarantee >= 2 grid steps so v7x's two TensorCores both get work.
        max_tile = min(max_tile, _round_up(_cdiv(batch_r, 2), SUBLANE))
    n_tiles = _cdiv(batch_r, max_tile)
    batch_tile = _round_up(_cdiv(batch_r, n_tiles), SUBLANE)   # balanced tiles
    batch_p = n_tiles * batch_tile

    # ---- pad the batch only if needed (no feature-dim padding in HBM) ------
    z = momenta
    if batch_p != batch:
        z = jnp.pad(z, ((0, batch_p - batch), (0, 0)))

    for gi, (s, e) in enumerate(groups):
        last_group = gi == len(groups) - 1
        z = _call_fused_group(
            z, layers[s:e],
            act_last=not last_group,       # global last layer has no activation
            batch_tile=batch_tile,
            true_dims=dims[s:e + 1],
            out_dtype=momenta.dtype if last_group else jnp.float32,
            precision=precision,
        )

    assert z.shape == (batch_p, dout_final)
    return z[:batch] if batch_p != batch else z


# ---------------------------------------------------------------------------
# FNN parameter init (xavier_normal_ weights, zero bias) + pure-JAX reference.
# ---------------------------------------------------------------------------
def init_fnn_params(key, layer_sizes):
    params = []
    for i in range(1, len(layer_sizes)):
        fan_in, fan_out = layer_sizes[i - 1], layer_sizes[i]
        key, wkey = jax.random.split(key)
        std = (2.0 / (fan_in + fan_out)) ** 0.5          # xavier normal, gain=1
        # Stored as (fan_in, fan_out) == PyTorch weight.T
        w = std * jax.random.normal(wkey, (fan_in, fan_out), dtype=jnp.float32)
        b = jnp.zeros((1, fan_out), dtype=jnp.float32)    # zeros_ bias
        params.append((w, b))
    return params


def fnn_reference(params, momenta):
    z = momenta
    for w, b in params[:-1]:
        z = jnp.tanh(z @ w + b)
    w, b = params[-1]
    return z @ w + b


if __name__ == "__main__":
    layer_sizes = [4, 32, 32, 2]
    batch = 8

    key = jax.random.PRNGKey(0)
    pkey, xkey = jax.random.split(key)
    params = init_fnn_params(pkey, layer_sizes)
    momenta = jax.random.normal(xkey, (batch, layer_sizes[0]), dtype=jnp.float32)

    ref = fnn_reference(params, momenta)

    # f32 path (same default MXU precision as the JAX reference).
    prepared_f32 = prepare_fnn_params(params, dtype=jnp.float32)
    out = jax.block_until_ready(fnn_forward(prepared_f32, momenta))
    assert out.shape == (batch, layer_sizes[-1]), out.shape
    assert jnp.allclose(out, ref, atol=1e-5, rtol=1e-5), "f32 mismatch vs reference"

    # bf16-weight path (recommended on v6e/v7x: bf16-native MXU, half the
    # weight HBM/VMEM footprint); f32 accumulation, loose tolerance vs f32 ref.
    prepared_bf16 = prepare_fnn_params(params, dtype=jnp.bfloat16)
    out_bf16 = jax.block_until_ready(fnn_forward(prepared_bf16, momenta))
    assert out_bf16.shape == (batch, layer_sizes[-1]), out_bf16.shape
    assert jnp.allclose(out_bf16, ref, atol=5e-2, rtol=5e-2), "bf16 mismatch vs reference"

    print("KERNEL_OK")
</pallas_src>

<mosaic_0001>
module attributes {stable_mosaic.version = 11 : i64} {
  func.func @kernel(%arg0: i32, %arg1: memref<8x4xf32, #tpu.memory_space<vmem>>, %arg2: memref<4x128xf32, #tpu.memory_space<vmem>>, %arg3: memref<1x128xf32, #tpu.memory_space<vmem>>, %arg4: memref<128x128xf32, #tpu.memory_space<vmem>>, %arg5: memref<1x128xf32, #tpu.memory_space<vmem>>, %arg6: memref<128x2xf32, #tpu.memory_space<vmem>>, %arg7: memref<1x2xf32, #tpu.memory_space<vmem>>, %arg8: memref<8x2xf32, #tpu.memory_space<vmem>>) attributes {dimension_semantics = [#tpu.dimension_semantics<parallel>], iteration_bounds = array<i64: 1>, scalar_prefetch = 0 : i64, scratch_operands = 0 : i64, tpu.core_type = #tpu.core_type<tc>, window_params = [{transform_indices = @transform_0, window_bounds = array<i64: 8, 4>}, {pipeline_mode = #tpu.pipeline_mode<synchronous>, transform_indices = @transform_1, window_bounds = array<i64: 4, 128>}, {pipeline_mode = #tpu.pipeline_mode<synchronous>, transform_indices = @transform_2, window_bounds = array<i64: 1, 128>}, {pipeline_mode = #tpu.pipeline_mode<synchronous>, transform_indices = @transform_3, window_bounds = array<i64: 128, 128>}, {pipeline_mode = #tpu.pipeline_mode<synchronous>, transform_indices = @transform_4, window_bounds = array<i64: 1, 128>}, {pipeline_mode = #tpu.pipeline_mode<synchronous>, transform_indices = @transform_5, window_bounds = array<i64: 128, 2>}, {pipeline_mode = #tpu.pipeline_mode<synchronous>, transform_indices = @transform_6, window_bounds = array<i64: 1, 2>}, {transform_indices = @transform_7, window_bounds = array<i64: 8, 2>}]} {
    %c0 = arith.constant 0 : index
    %c0_0 = arith.constant 0 : index
    %0 = vector.load %arg1[%c0, %c0_0] : memref<8x4xf32, #tpu.memory_space<vmem>>, vector<8x4xf32>
    %c0_1 = arith.constant 0 : index
    %c0_2 = arith.constant 0 : index
    %1 = vector.load %arg2[%c0_1, %c0_2] : memref<4x128xf32, #tpu.memory_space<vmem>>, vector<4x128xf32>
    %c0_3 = arith.constant 0 : index
    %c0_4 = arith.constant 0 : index
    %2 = vector.load %arg3[%c0_3, %c0_4] : memref<1x128xf32, #tpu.memory_space<vmem>>, vector<1x128xf32>
    %cst = arith.constant dense<0.000000e+00> : vector<8x128xf32>
    %3 = tpu.matmul %0, %1, %cst {dimension_numbers = #tpu.dot_dimension_numbers<[1], [0], [0], [1], [0, 0, 1, 1], [], []>} : vector<8x4xf32>, vector<4x128xf32>, vector<8x128xf32> -> vector<8x128xf32>
    %4 = vector.broadcast %2 : vector<1x128xf32> to vector<8x128xf32>
    %5 = arith.addf %3, %4 : vector<8x128xf32>
    %6 = math.tanh %5 : vector<8x128xf32>
    %c0_5 = arith.constant 0 : index
    %c0_6 = arith.constant 0 : index
    %7 = vector.load %arg4[%c0_5, %c0_6] : memref<128x128xf32, #tpu.memory_space<vmem>>, vector<128x128xf32>
    %c0_7 = arith.constant 0 : index
    %c0_8 = arith.constant 0 : index
    %8 = vector.load %arg5[%c0_7, %c0_8] : memref<1x128xf32, #tpu.memory_space<vmem>>, vector<1x128xf32>
    %cst_9 = arith.constant dense<0.000000e+00> : vector<8x128xf32>
    %9 = tpu.matmul %6, %7, %cst_9 {dimension_numbers = #tpu.dot_dimension_numbers<[1], [0], [0], [1], [0, 0, 1, 1], [], []>} : vector<8x128xf32>, vector<128x128xf32>, vector<8x128xf32> -> vector<8x128xf32>
    %10 = vector.broadcast %8 : vector<1x128xf32> to vector<8x128xf32>
    %11 = arith.addf %9, %10 : vector<8x128xf32>
    %12 = math.tanh %11 : vector<8x128xf32>
    %c0_10 = arith.constant 0 : index
    %c0_11 = arith.constant 0 : index
    %13 = vector.load %arg6[%c0_10, %c0_11] : memref<128x2xf32, #tpu.memory_space<vmem>>, vector<128x2xf32>
    %c0_12 = arith.constant 0 : index
    %c0_13 = arith.constant 0 : index
    %14 = vector.load %arg7[%c0_12, %c0_13] : memref<1x2xf32, #tpu.memory_space<vmem>>, vector<1x2xf32>
    %cst_14 = arith.constant dense<0.000000e+00> : vector<8x2xf32>
    %15 = tpu.matmul %12, %13, %cst_14 {dimension_numbers = #tpu.dot_dimension_numbers<[1], [0], [0], [1], [0, 0, 1, 1], [], []>} : vector<8x128xf32>, vector<128x2xf32>, vector<8x2xf32> -> vector<8x2xf32>
    %16 = vector.broadcast %14 : vector<1x2xf32> to vector<8x2xf32>
    %17 = arith.addf %15, %16 : vector<8x2xf32>
    %c0_15 = arith.constant 0 : index
    %c0_16 = arith.constant 0 : index
    %18 = vector.load %arg8[%c0_15, %c0_16] : memref<8x2xf32, #tpu.memory_space<vmem>>, vector<8x2xf32>
    tpu.vector_store %arg8[%c0_15, %c0_16], %17 {strides = array<i32>} : memref<8x2xf32, #tpu.memory_space<vmem>>, vector<8x2xf32>,
    return
  }
  func.func @transform_0(%arg0: i32) -> (i32, i32) {
    %c0_i32 = arith.constant 0 : i32
    %c0_i32_0 = arith.constant 0 : i32
    return %arg0, %c0_i32 : i32, i32
  }
  func.func @transform_1(%arg0: i32) -> (i32, i32) {
    %c0_i32 = arith.constant 0 : i32
    %c0_i32_0 = arith.constant 0 : i32
    %c0_i32_1 = arith.constant 0 : i32
    return %c0_i32, %c0_i32_0 : i32, i32
  }
  func.func @transform_2(%arg0: i32) -> (i32, i32) {
    %c0_i32 = arith.constant 0 : i32
    %c0_i32_0 = arith.constant 0 : i32
    %c0_i32_1 = arith.constant 0 : i32
    return %c0_i32, %c0_i32_0 : i32, i32
  }
  func.func @transform_3(%arg0: i32) -> (i32, i32) {
    %c0_i32 = arith.constant 0 : i32
    %c0_i32_0 = arith.constant 0 : i32
    %c0_i32_1 = arith.constant 0 : i32
    return %c0_i32, %c0_i32_0 : i32, i32
  }
  func.func @transform_4(%arg0: i32) -> (i32, i32) {
    %c0_i32 = arith.constant 0 : i32
    %c0_i32_0 = arith.constant 0 : i32
    %c0_i32_1 = arith.constant 0 : i32
    return %c0_i32, %c0_i32_0 : i32, i32
  }
  func.func @transform_5(%arg0: i32) -> (i32, i32) {
    %c0_i32 = arith.constant 0 : i32
    %c0_i32_0 = arith.constant 0 : i32
    %c0_i32_1 = arith.constant 0 : i32
    return %c0_i32, %c0_i32_0 : i32, i32
  }
  func.func @transform_6(%arg0: i32) -> (i32, i32) {
    %c0_i32 = arith.constant 0 : i32
    %c0_i32_0 = arith.constant 0 : i32
    %c0_i32_1 = arith.constant 0 : i32
    return %c0_i32, %c0_i32_0 : i32, i32
  }
  func.func @transform_7(%arg0: i32) -> (i32, i32) {
    %c0_i32 = arith.constant 0 : i32
    %c0_i32_0 = arith.constant 0 : i32
    return %arg0, %c0_i32 : i32, i32
  }
}

</mosaic_0001>

<bundles_post_ra>
// kernel: tpu_custom_call.1
= control target key start
LH: loop header
LB: loop body
LE: loop exit
PB: predicated region body
PF: predicated region fallthrough
CT: control target
= control target key end

     0   :  { %vm39_vm0 = vcmask 1043456   ;;  %vm35_vm1 = vcmask 31744   ;;  %v478_v0 = vmov 0.0   ;;  %vm479_vm2 = vmmov 0   ;;  %s651_s1 = inlined_call_operand.vmem [shape: f32[4,128], index: 1, kind: input, shape index: {}]   ;;  %s652_s0 = inlined_call_operand.vmem [shape: f32[8,4], index: 0, kind: input, shape index: {}]   ;;  %s653_s3 = inlined_call_operand.vmem [shape: f32[128,128], index: 3, kind: input, shape index: {}]   ;;  %s654_s5 = inlined_call_operand.vmem [shape: f32[128,2], index: 5, kind: input, shape index: {}]   ;;  %s655_s2 = inlined_call_operand.vmem [shape: f32[1,128], index: 2, kind: input, shape index: {}]   ;;  %s656_s4 = inlined_call_operand.vmem [shape: f32[1,128], index: 4, kind: input, shape index: {}]   ;;  %s657_s6 = inlined_call_operand.vmem [shape: f32[1,2], index: 6, kind: input, shape index: {}]   ;;  %s658_s7 = inlined_call_operand.vmem [shape: f32[8,2], index: 7, kind: output, shape index: {}]  }
   0x1   :  { %348 = vmatprep.subr.mxu0 %v478_v0  ;;  %v27_v1 = vld [vmem:[%s651_s1] sm:$0xf]  ;;  %350 = vmatprep.mubr.msk.f32.mxu0 %vm479_vm2, %v478_v0  ;;  %v480_v4 = vmov 0.0|0.0   ;;  %v115_v5 = vld [vmem:[%s653_s3 + $0x8] sm:$0xff]  ;;  %v116_v6 = vld [vmem:[%s653_s3 + $0x10] sm:$0xff]  ;;  %vm301_vm3 = vcmask 15360  }
   0x2   :  { %v26_v2 = vld [vmem:[%s652_s0] sm:$0xff]  ;;  %349 = vmatpush3.msk.msra.mxu0 %vm39_vm0, %v27_v1  ;;  %423 = vmatprep.subr.bf16.mxu1 %v480_v4  ;;  %v117_v7 = vld [vmem:[%s653_s3 + $0x18] sm:$0xff]  ;;  %v119_v11 = vld [vmem:[%s653_s3 + $0x28] sm:$0xff] }
   0x3   :  { %v114_v3 = vld [vmem:[%s653_s3] sm:$0xff]  ;;  %351 = vmatmul.mubr.msk.f32.vlgmr.msra.gmra.mrb[0].mxu0 %vm35_vm1, %v26_v2  ;;  %385 = vmatprep.mubr.msk.f32.mxu1 %vm479_vm2, %v478_v0  ;;  %v427_v9 = vpack.c.bf16 %v117_v7, %v116_v6  ;;  %v120_v13 = vld [vmem:[%s653_s3 + $0x30] sm:$0xff]  ;;  %v121_v14 = vld [vmem:[%s653_s3 + $0x38] sm:$0xff] }
   0x4   :  { %v424_v8 = vpack.c.bf16 %v115_v5, %v114_v3  ;;  %447 = vmatprep.subr.bf16.mxu0 %v480_v4  ;;  %420 = vmatprep.mubr.msk.f32.mxu0 %vm479_vm2, %v478_v0  ;;  %v118_v10 = vld [vmem:[%s653_s3 + $0x20] sm:$0xff]  ;;  %v433_v15 = vpack.c.bf16 %v121_v14, %v120_v13  ;;  %v123_v17 = vld [vmem:[%s653_s3 + $0x48] sm:$0xff]  ;;  %v124_v19 = vld [vmem:[%s653_s3 + $0x50] sm:$0xff] }
   0x5   :  { %v430_v12 = vpack.c.bf16 %v119_v11, %v118_v10  ;;  %v122_v16 = vld [vmem:[%s653_s3 + $0x40] sm:$0xff]  ;;  %v125_v20 = vld [vmem:[%s653_s3 + $0x58] sm:$0xff]  ;;  %v127_v23 = vld [vmem:[%s653_s3 + $0x68] sm:$0xff] }
   0x6   :  { %425 = vmatpush3.bf16.msra.mxu1 %v424_v8  ;;  %v436_v18 = vpack.c.bf16 %v123_v17, %v122_v16  ;;  %v439_v21 = vpack.c.bf16 %v125_v20, %v124_v19  ;;  %v126_v22 = vld [vmem:[%s653_s3 + $0x60] sm:$0xff]  ;;  %v128_v25 = vld [vmem:[%s653_s3 + $0x70] sm:$0xff]  ;;  %v129_v26 = vld [vmem:[%s653_s3 + $0x78] sm:$0xff] }
   0x7   :  { %426 = vmatprep.subr.bf16.mxu1 %v480_v4  ;;  %v442_v24 = vpack.c.bf16 %v127_v23, %v126_v22  ;;  %v445_v27 = vpack.c.bf16 %v129_v26, %v128_v25  ;;  %v208_v28 = vld [vmem:[%s654_s5] sm:$0xff]  ;;  %v209_v29 = vld [vmem:[%s654_s5 + $0x8] sm:$0xff]  ;;  %v210_v30 = vld [vmem:[%s654_s5 + $0x10] sm:$0xff] }
   0x8   :  { %v448_v31 = vpack.c.bf16 %v209_v29, %v208_v28  ;;  %v211_v32 = vld [vmem:[%s654_s5 + $0x18] sm:$0xff]  ;;  %v212_v34 = vld [vmem:[%s654_s5 + $0x20] sm:$0xff]  ;;  %v213_v35 = vld [vmem:[%s654_s5 + $0x28] sm:$0xff] }
   0x9   :  { %v451_v33 = vpack.c.bf16 %v211_v32, %v210_v30  ;;  %v454_v36 = vpack.c.bf16 %v213_v35, %v212_v34  ;;  %v214_v37 = vld [vmem:[%s654_s5 + $0x30] sm:$0xff]  ;;  %v215_v38 = vld [vmem:[%s654_s5 + $0x38] sm:$0xff]  ;;  %v216_v40 = vld [vmem:[%s654_s5 + $0x40] sm:$0xff] }
   0xa   :  { %428 = vmatpush3.bf16.msra.mxu1 %v427_v9  ;;  %449 = vmatpush3.bf16.msra.mxu0 %v448_v31  ;;  %v457_v39 = vpack.c.bf16 %v215_v38, %v214_v37  ;;  %v217_v41 = vld [vmem:[%s654_s5 + $0x48] sm:$0xff]  ;;  %v307_v43 = vld [vmem:[%s655_s2] ss:$0 sm:$0xff]  ;;  %v218_v48 = vld [vmem:[%s654_s5 + $0x50] sm:$0xff] }
   0xb   :  { %429 = vmatprep.subr.bf16.mxu1 %v480_v4  ;;  %450 = vmatprep.subr.bf16.mxu0 %v480_v4  ;;  %v460_v42 = vpack.c.bf16 %v217_v41, %v216_v40  ;;  %v219_v49 = vld [vmem:[%s654_s5 + $0x58] sm:$0xff]  ;;  %v220_v51 = vld [vmem:[%s654_s5 + $0x60] sm:$0xff]  ;;  %v221_v52 = vld [vmem:[%s654_s5 + $0x68] sm:$0xff] }
   0xc   :  { %v463_v50 = vpack.c.bf16 %v219_v49, %v218_v48  ;;  %v466_v53 = vpack.c.bf16 %v221_v52, %v220_v51  ;;  %v222_v54 = vld [vmem:[%s654_s5 + $0x70] sm:$0xff]  ;;  %v223_v55 = vld [vmem:[%s654_s5 + $0x78] sm:$0xff]  ;;  %v310_v57 = vld [vmem:[%s656_s4] ss:$0 sm:$0xff] }
   0xd   :  { %v469_v56 = vpack.c.bf16 %v223_v55, %v222_v54  ;;  %v311_v62 = vld [vmem:[%s657_s6] ss:$0 sm:$0xff] }
   0xe   :  { %431 = vmatpush3.bf16.msra.mxu1 %v430_v12  ;;  %452 = vmatpush3.bf16.msra.mxu0 %v451_v33 }
   0xf   :  { %432 = vmatprep.subr.bf16.mxu1 %v480_v4  ;;  %453 = vmatprep.subr.bf16.mxu0 %v480_v4 }
  0x12   :  { %434 = vmatpush3.bf16.msra.mxu1 %v433_v15  ;;  %455 = vmatpush3.bf16.msra.mxu0 %v454_v36 }
  0x13   :  { %435 = vmatprep.subr.bf16.mxu1 %v480_v4  ;;  %456 = vmatprep.subr.bf16.mxu0 %v480_v4 }
  0x16   :  { %437 = vmatpush3.bf16.msra.mxu1 %v436_v18  ;;  %458 = vmatpush3.bf16.msra.mxu0 %v457_v39 }
  0x17   :  { %438 = vmatprep.subr.bf16.mxu1 %v480_v4  ;;  %459 = vmatprep.subr.bf16.mxu0 %v480_v4 }
  0x1a   :  { %440 = vmatpush3.bf16.msra.mxu1 %v439_v21  ;;  %461 = vmatpush3.bf16.msra.mxu0 %v460_v42 }
  0x1b   :  { %441 = vmatprep.subr.bf16.mxu1 %v480_v4  ;;  %462 = vmatprep.subr.bf16.mxu0 %v480_v4 }
  0x1e   :  { %443 = vmatpush3.bf16.msra.mxu1 %v442_v24  ;;  %464 = vmatpush3.bf16.msra.mxu0 %v463_v50 }
  0x1f   :  { %444 = vmatprep.subr.bf16.mxu1 %v480_v4  ;;  %465 = vmatprep.subr.bf16.mxu0 %v480_v4 }
  0x22   :  { %446 = vmatpush3.bf16.msra.mxu1 %v445_v27  ;;  %467 = vmatpush3.bf16.msra.mxu0 %v466_v53 }
  0x23   :  { %468 = vmatprep.subr.bf16.mxu0 %v480_v4 }
  0x26   :  { %470 = vmatpush3.bf16.msra.mxu0 %v469_v56 }
  0xd6   :  { %v109_v44 = vpop.f32.mrb[0].mxu0 }
  0xd7   :  { %v110_v45 = vadd.f32 %v307_v43, %v109_v44  ;;  %v352_v46 = vpop.f32.mrb[1].mxu0 }
  0xd9   :  { %474 = vtanh.f32 %v110_v45 }
  0xe3   :  { %v475_v47 = vpop.eup %474 }
  0xe4   :  { %386 = vmatmul.mubr.f32.vlgmr.msra.gmra.mrb[0].mxu1 %v475_v47 }
 0x1b7   :  { %v203_v58 = vpop.f32.mrb[0].mxu1 }
 0x1b8   :  { %v204_v59 = vadd.f32 %v310_v57, %v203_v58  ;;  %v387_v60 = vpop.f32.mrb[1].mxu1 }
 0x1ba   :  { %476 = vtanh.f32 %v204_v59 }
 0x1c4   :  { %v477_v61 = vpop.eup %476 }
 0x1c5   :  { %421 = vmatmul.mubr.f32.vlgmr.msra.gmra.mrb[2].mxu0 %v477_v61 }
 0x298   :  { %v297_v63 = vpop.f32.mrb[2].mxu0 }
 0x299   :  { %v298_v0 = vadd.f32 %v311_v62, %v297_v63  ;;  %v422_v1 = vpop.f32.mrb[3].mxu0 }
 0x29b   :  { %302 = vst.msk [vmem:[%s658_s7] sm:$0xff] %vm301_vm3, %v298_v0 }

</bundles_post_ra>
